<compile_context>
chip_gen: v7x
topology: tpu7x:2x2x1
jax: 0.10.0
libtpu: 0.0.40
codegen_flags: <defaults>
</compile_context>

<pallas_src>
import jax
import jax.numpy as jnp
from jax.experimental import pallas as pl
from jax.experimental.pallas import tpu as pltpu


def nn1relu_kernel(params_ref, x_ref, o_ref):
    # params_ref: (12,) f32 in SMEM, packed row-major as
    #   [w0[0,0], w0[0,1], w0[1,0], w0[1,1], b0[0], b0[1],
    #    w1[0,0], w1[0,1], w1[1,0], w1[1,1], b1[0], b1[1]]
    x = x_ref[...]                       # (B, 2) in VMEM

    w000 = params_ref[0]
    w001 = params_ref[1]
    w010 = params_ref[2]
    w011 = params_ref[3]
    b00 = params_ref[4]
    b01 = params_ref[5]
    w100 = params_ref[6]
    w101 = params_ref[7]
    w110 = params_ref[8]
    w111 = params_ref[9]
    b10 = params_ref[10]
    b11 = params_ref[11]

    x0 = x[:, 0:1]                       # (B, 1)
    x1 = x[:, 1:2]                       # (B, 1)

    # ---- Layer 0: Linear(2->2) + ReLU, scalar-operand VPU FMAs ----
    h0 = jnp.maximum(x0 * w000 + x1 * w010 + b00, 0.0)   # (B, 1)
    h1 = jnp.maximum(x0 * w001 + x1 * w011 + b01, 0.0)   # (B, 1)

    # ---- Layer 1 + 2-class softmax collapsed to one logistic per row ----
    # d = z0 - z1;  softmax(z)_0 = sigmoid(d);  softmax(z)_1 = 1 - sigmoid(d)
    dw0 = w100 - w101                    # scalar ALU
    dw1 = w110 - w111
    db = b10 - b11
    d = h0 * dw0 + h1 * dw1 + db         # (B, 1)
    p0 = jax.nn.sigmoid(d)               # logistic -> EUP slot
    p1 = 1.0 - p0

    o_ref[...] = jnp.concatenate([p0, p1], axis=-1)       # (B, 2)


def nn1relu_forward(x, w0, b0, w1, b1):
    B = x.shape[0]
    O = w1.shape[1]
    # Pack all parameters into one tiny flat SMEM-resident array.
    params = jnp.concatenate(
        [w0.reshape(-1), b0.reshape(-1), w1.reshape(-1), b1.reshape(-1)]
    ).astype(jnp.float32)                # (12,)

    smem_spec = pl.BlockSpec(memory_space=pltpu.MemorySpace.SMEM)
    vmem_spec = pl.BlockSpec(memory_space=pltpu.MemorySpace.VMEM)
    return pl.pallas_call(
        nn1relu_kernel,
        out_shape=jax.ShapeDtypeStruct((B, O), jnp.float32),
        in_specs=[smem_spec, vmem_spec],
        out_specs=vmem_spec,
    )(params, x)


def reference_forward(x, w0, b0, w1, b1):
    h = jnp.maximum(x @ w0 + b0, 0.0)
    z = h @ w1 + b1
    return jax.nn.softmax(z, axis=-1)


if __name__ == "__main__":
    key = jax.random.PRNGKey(0)
    k_x, k_w0, k_b0, k_w1, k_b1 = jax.random.split(key, 5)

    B, D_IN, D_HID, D_OUT = 8, 2, 2, 2

    # Deterministic parameter init: U(-1/sqrt(fan_in), 1/sqrt(fan_in)),
    # matching the homework's LinearLayer init convention.
    bound0 = 1.0 / jnp.sqrt(D_IN)
    bound1 = 1.0 / jnp.sqrt(D_HID)
    w0 = jax.random.uniform(k_w0, (D_IN, D_HID), jnp.float32, -bound0, bound0)
    b0 = jax.random.uniform(k_b0, (1, D_HID), jnp.float32, -bound0, bound0)
    w1 = jax.random.uniform(k_w1, (D_HID, D_OUT), jnp.float32, -bound1, bound1)
    b1 = jax.random.uniform(k_b1, (1, D_OUT), jnp.float32, -bound1, bound1)

    x = jax.random.normal(k_x, (B, D_IN), jnp.float32)

    out = nn1relu_forward(x, w0, b0, w1, b1)
    out = jax.block_until_ready(out)

    ref = reference_forward(x, w0, b0, w1, b1)
    assert out.shape == (B, D_OUT)
    assert jnp.allclose(out, ref, atol=1e-5, rtol=1e-5)
    # rows of a softmax output must sum to 1 (exact by construction: p1 = 1-p0)
    assert jnp.allclose(jnp.sum(out, axis=-1), jnp.ones((B,)), atol=1e-5)

    print("KERNEL_OK")
</pallas_src>

<mosaic_0001>
module attributes {stable_mosaic.version = 11 : i64} {
  func.func @nn1relu_kernel(%arg0: memref<12xf32, #tpu.memory_space<smem>>, %arg1: memref<8x2xf32, #tpu.memory_space<vmem>>, %arg2: memref<8x2xf32, #tpu.memory_space<vmem>>) attributes {dimension_semantics = [], scalar_prefetch = 0 : i64, scratch_operands = 0 : i64, tpu.core_type = #tpu.core_type<tc>} {
    %c0 = arith.constant 0 : index
    %c0_0 = arith.constant 0 : index
    %0 = vector.load %arg1[%c0, %c0_0] : memref<8x2xf32, #tpu.memory_space<vmem>>, vector<8x2xf32>
    %c0_1 = arith.constant 0 : index
    %1 = memref.load %arg0[%c0_1] : memref<12xf32, #tpu.memory_space<smem>>
    %c1 = arith.constant 1 : index
    %2 = memref.load %arg0[%c1] : memref<12xf32, #tpu.memory_space<smem>>
    %c2 = arith.constant 2 : index
    %3 = memref.load %arg0[%c2] : memref<12xf32, #tpu.memory_space<smem>>
    %c3 = arith.constant 3 : index
    %4 = memref.load %arg0[%c3] : memref<12xf32, #tpu.memory_space<smem>>
    %c4 = arith.constant 4 : index
    %5 = memref.load %arg0[%c4] : memref<12xf32, #tpu.memory_space<smem>>
    %c5 = arith.constant 5 : index
    %6 = memref.load %arg0[%c5] : memref<12xf32, #tpu.memory_space<smem>>
    %c6 = arith.constant 6 : index
    %7 = memref.load %arg0[%c6] : memref<12xf32, #tpu.memory_space<smem>>
    %c7 = arith.constant 7 : index
    %8 = memref.load %arg0[%c7] : memref<12xf32, #tpu.memory_space<smem>>
    %c8 = arith.constant 8 : index
    %9 = memref.load %arg0[%c8] : memref<12xf32, #tpu.memory_space<smem>>
    %c9 = arith.constant 9 : index
    %10 = memref.load %arg0[%c9] : memref<12xf32, #tpu.memory_space<smem>>
    %c10 = arith.constant 10 : index
    %11 = memref.load %arg0[%c10] : memref<12xf32, #tpu.memory_space<smem>>
    %c11 = arith.constant 11 : index
    %12 = memref.load %arg0[%c11] : memref<12xf32, #tpu.memory_space<smem>>
    %13 = vector.extract_strided_slice %0 {offsets = [0, 0], sizes = [8, 1], strides = [1, 1]} : vector<8x2xf32> to vector<8x1xf32>
    %14 = vector.extract_strided_slice %0 {offsets = [0, 1], sizes = [8, 1], strides = [1, 1]} : vector<8x2xf32> to vector<8x1xf32>
    %15 = vector.broadcast %1 : f32 to vector<8x1xf32>
    %16 = arith.mulf %13, %15 : vector<8x1xf32>
    %17 = vector.broadcast %3 : f32 to vector<8x1xf32>
    %18 = arith.mulf %14, %17 : vector<8x1xf32>
    %19 = arith.addf %16, %18 : vector<8x1xf32>
    %20 = vector.broadcast %5 : f32 to vector<8x1xf32>
    %21 = arith.addf %19, %20 : vector<8x1xf32>
    %cst = arith.constant 0.000000e+00 : f32
    %22 = vector.broadcast %cst : f32 to vector<8x1xf32>
    %23 = arith.maximumf %21, %22 : vector<8x1xf32>
    %24 = vector.broadcast %2 : f32 to vector<8x1xf32>
    %25 = arith.mulf %13, %24 : vector<8x1xf32>
    %26 = vector.broadcast %4 : f32 to vector<8x1xf32>
    %27 = arith.mulf %14, %26 : vector<8x1xf32>
    %28 = arith.addf %25, %27 : vector<8x1xf32>
    %29 = vector.broadcast %6 : f32 to vector<8x1xf32>
    %30 = arith.addf %28, %29 : vector<8x1xf32>
    %cst_2 = arith.constant 0.000000e+00 : f32
    %31 = vector.broadcast %cst_2 : f32 to vector<8x1xf32>
    %32 = arith.maximumf %30, %31 : vector<8x1xf32>
    %33 = arith.subf %7, %8 : f32
    %34 = arith.subf %9, %10 : f32
    %35 = arith.subf %11, %12 : f32
    %36 = vector.broadcast %33 : f32 to vector<8x1xf32>
    %37 = arith.mulf %23, %36 : vector<8x1xf32>
    %38 = vector.broadcast %34 : f32 to vector<8x1xf32>
    %39 = arith.mulf %32, %38 : vector<8x1xf32>
    %40 = arith.addf %37, %39 : vector<8x1xf32>
    %41 = vector.broadcast %35 : f32 to vector<8x1xf32>
    %42 = arith.addf %40, %41 : vector<8x1xf32>
    %43 = arith.negf %42 : vector<8x1xf32>
    %44 = math.exp %43 : vector<8x1xf32>
    %cst_3 = arith.constant 1.000000e+00 : f32
    %45 = vector.broadcast %cst_3 : f32 to vector<8x1xf32>
    %46 = arith.addf %45, %44 : vector<8x1xf32>
    %47 = arith.divf %45, %46 : vector<8x1xf32>
    %cst_4 = arith.constant 1.000000e+00 : f32
    %48 = vector.broadcast %cst_4 : f32 to vector<8x1xf32>
    %49 = arith.subf %48, %47 : vector<8x1xf32>
    %50 = tpu.concatenate %47, %49 in 1 : vector<8x1xf32>, vector<8x1xf32> -> vector<8x2xf32>
    %c0_5 = arith.constant 0 : index
    %c0_6 = arith.constant 0 : index
    %51 = vector.load %arg2[%c0_5, %c0_6] : memref<8x2xf32, #tpu.memory_space<vmem>>, vector<8x2xf32>
    tpu.vector_store %arg2[%c0_5, %c0_6], %50 {strides = array<i32>} : memref<8x2xf32, #tpu.memory_space<vmem>>, vector<8x2xf32>,
    return
  }
}

</mosaic_0001>

<bundles_post_ra>
// kernel: tpu_custom_call.1
= control target key start
LH: loop header
LB: loop body
LE: loop exit
PB: predicated region body
PF: predicated region fallthrough
CT: control target
= control target key end

     0   :  { %7 = vsyncpa [#allocation3], 0  ;;  %s151_s0 = inlined_call_operand.vmem [shape: f32[12], index: 0, kind: input, shape index: {}]   ;;  %s152_s1 = inlined_call_operand.vmem [shape: f32[8,2], index: 1, kind: input, shape index: {}]   ;;  %s153_s2 = inlined_call_operand.vmem [shape: f32[8,2], index: 2, kind: output, shape index: {}]  }
   0x1   :  { %s14_s11 = sshll.u32 %s151_s0, 4  ;;  %s15_s11 = int_to_ptr.vmem [resolvable:$true] %s14_s11 }
   0x2   :  { %s110_s12 = scalar_lea.vmem %s15_s11, 16  ;;  %p115_p1 = scmp.lt.s32.totalorder %s15_s11, %s15_s11 }
   0x3   :  { %p111_p0 = scmp.ne.s32.totalorder %s15_s11, %s110_s12  ;;  %p116_p2 = scmp.lt.s32.totalorder %s110_s12, %s110_s12 }
   0x5   :  { %p117_p3 = por %p116_p2, %p115_p1 }
   0x7   :  { %p118_p4 = pnand %p117_p3, %p111_p0 }
   0x9   :  { %121 = shalt.err (!%p118_p4)
}
   0xa   :  { %s124_s13 = smov [#allocation2]  }
   0xb   :  { %17 = dma.vmem_to_smem %s15_s11, 16, %s124_s13, [#allocation3]  }
   0xc   :  { %122 = dma.done.wait [#allocation3], 16  }
   0xd   :  { %123 = vsyncadd [#allocation3], 4294967280 }
   0xe   :  { %23 = sfence }
   0xf   :  { %s92_s14 = sld [smem:[#allocation2 + $0x2]]  ;;  %s93_s15 = sld [smem:[#allocation2 + $0x3]]  ;;  %v24_v0 = vld [vmem:[%s152_s1] sm:$0xff]  ;;  %vm82_vm0 = vcmask 7168   ;;  %vm84_vm1 = vcmask 15360  }
  0x10   :  { %s125_s0 = smov 127   ;;  %s25_s18 = sld [smem:[#allocation2]] }
  0x11   :  { %s91_s19 = sld [smem:[#allocation2 + $0x1]]  ;;  %s94_s20 = sld [smem:[#allocation2 + $0x4]] }
  0x12   :  { %s96_s21 = sld [smem:[#allocation2 + $0x6]]  ;;  %s97_s22 = sld [smem:[#allocation2 + $0x7]] }
  0x13   :  { %s95_s23 = sld [smem:[#allocation2 + $0x5]]  ;;  %s98_s24 = sld [smem:[#allocation2 + $0x8]] }
  0x14   :  { %s99_s25 = sld [smem:[#allocation2 + $0x9]]  ;;  %s100_s1 = sld [smem:[#allocation2 + $0xa]] }
  0x15   :  { %v39_v1 = vstv %s92_s14  ;;  %v51_v3 = vstv %s93_s15  ;;  %s101_s26 = sld [smem:[#allocation2 + $0xb]]  ;;  %s126_s30 = smov 1  }
  0x16   :  { %v40_v2 = vmul.f32 %v39_v1, %v24_v0  ;;  %v52_v4 = vmul.f32 %v51_v3, %v24_v0  ;;  %v37_v5 = vstv %s25_s18 }
  0x17   :  { %v38_v6 = vmul.f32 %v37_v5, %v24_v0  ;;  %v49_v7 = vstv %s91_s19  ;;  %v46_v8 = vstv %s94_s20 }
  0x18   :  { %42 = vrot.lane.b32.xlu0 %v40_v2, %s125_s0  ;;  %v50_v11 = vmul.f32 %v49_v7, %v24_v0  ;;  %s61_s27 = ssub.f32 %s96_s21, %s97_s22 }
  0x19   :  { %v58_v13 = vstv %s95_s23 }
  0x1a   :  { %s62_s28 = ssub.f32 %s98_s24, %s99_s25  ;;  %v64_v18 = vstv %s61_s27 }
  0x1b   :  { %s63_s29 = ssub.f32 %s100_s1, %s101_s26 }
  0x1c   :  { %54 = vrot.lane.b32.xlu0 %v52_v4, %s125_s0  ;;  %v66_v19 = vstv %s62_s28 }
  0x1d   :  { %v69_v23 = vstv %s63_s29 }
  0x8a   :  { %v43_v9 = vpop.permute.xlu0 %42 }
  0x8b   :  { %v45_v10 = vadd.f32 %v43_v9, %v38_v6 }
  0x8d   :  { %v47_v12 = vadd.f32 %v46_v8, %v45_v10 }
  0x8e   :  { %v55_v14 = vpop.permute.xlu0 %54 }
  0x8f   :  { %v57_v15 = vadd.f32 %v55_v14, %v50_v11  ;;  %v48_v16 = vmax.f32 %v47_v12, 0.0 }
  0x91   :  { %v59_v17 = vadd.f32 %v58_v13, %v57_v15  ;;  %v65_v21 = vmul.f32 %v64_v18, %v48_v16 }
  0x93   :  { %v60_v20 = vmax.f32 %v59_v17, 0.0 }
  0x95   :  { %v67_v22 = vmul.f32 %v66_v19, %v60_v20 }
  0x97   :  { %v68_v24 = vadd.f32 %v67_v22, %v65_v21 }
  0x99   :  { %v70_v25 = vadd.f32 %v69_v23, %v68_v24 }
  0x9b   :  { %v102_v26 = vmul.f32 -1.442695, %v70_v25 }
  0x9d   :  { %106 = vpow2.f32 %v102_v26 }
  0xa7   :  { %v107_v27 = vpop.eup %106 }
  0xa8   :  { %v74_v28 = vadd.f32 1.0, %v107_v27 }
  0xaa   :  { %108 = vrcp.f32 %v74_v28 }
  0xb4   :  { %v109_v29 = vpop.eup %108 }
  0xb5   :  { %v77_v30 = vsub.f32 1.0, %v109_v29 }
  0xb7   :  { %79 = vrot.lane.b32.xlu1 %v77_v30, %s126_s30 }
 0x129   :  { %v80_v31 = vpop.permute.xlu1 %79 }
 0x12a   :  { %v83_v32 = vsel %vm82_vm0, %v109_v29, %v80_v31 }
 0x12b   :  { %85 = vst.msk [vmem:[%s153_s2] sm:$0xff] %vm84_vm1, %v83_v32 }
 0x12c   :  { %90 = vsyncpa [#allocation3], 1 }

</bundles_post_ra>
